<compile_context>
chip_gen: v6e
topology: v6e:2x2x1
jax: 0.10.0
libtpu: 0.0.40
codegen_flags: <defaults>
</compile_context>

<pallas_src>
import functools

import jax
import jax.numpy as jnp
from jax.experimental import pallas as pl
from jax.experimental.pallas import tpu as pltpu


def _for_each_strip(n_strips, fn):
    """Run fn(s) for s in [0, n_strips); fully unrolled when short."""
    if n_strips <= 8:
        for s in range(n_strips):
            fn(s)
    else:
        def body(s, carry):
            fn(s)
            return carry
        jax.lax.fori_loop(0, n_strips, body, 0)


def _recon_loss_kernel(x_ref, y_ref, out_ref,
                       colmin_ref, yy_ref, rowmin_ref, rowacc_ref,
                       *, n_strips):
    """One grid step = (batch group g, row tile n).

    x_ref:      (Bt, TN, Dp)       coords_ori row tile (Dp = D padded to 8)
    y_ref:      (Bt, Sn, Dp, S)    point_cloud_1, strip-major, M on lanes
    out_ref:    (1, 8, 128)        per-group partial sum (written at last n)
    colmin_ref: (Sn, Bt, S)        running column mins of squared distances
    yy_ref:     (Sn, Bt, S)        ||y||^2 per strip (computed once at n == 0)
    rowmin_ref: (Bt, TN)           row mins (squared) for this row tile
    rowacc_ref: (Bt, TN)           accumulated sqrt(row mins) across row tiles
    """
    n = pl.program_id(1)
    n_last = pl.num_programs(1) - 1

    @pl.when(n == 0)
    def _():
        colmin_ref[...] = jnp.full(colmin_ref.shape, jnp.inf, colmin_ref.dtype)
        rowacc_ref[...] = jnp.zeros(rowacc_ref.shape, rowacc_ref.dtype)

        def init_strip(s):
            y = y_ref[:, s].astype(jnp.float32)                # (Bt, Dp, S)
            yy_ref[s] = jnp.sum(y * y, axis=1)                 # (Bt, S)

        _for_each_strip(n_strips, init_strip)

    x = x_ref[...].astype(jnp.float32)                         # (Bt, TN, Dp)
    xx = jnp.sum(x * x, axis=-1, keepdims=True)                # (Bt, TN, 1)

    rowmin_ref[...] = jnp.full(rowmin_ref.shape, jnp.inf, rowmin_ref.dtype)

    def strip_step(s):
        y = y_ref[:, s].astype(jnp.float32)                    # (Bt, Dp, S)
        # Cross term on the MXU (Dp = 8 contraction), f32 accumulation.
        xy = jnp.einsum("bnd,bds->bns", x, y,
                        preferred_element_type=jnp.float32)    # (Bt, TN, S)
        # No full-matrix clamp: mins are clamped just before sqrt.
        sq = (xx + yy_ref[s][:, None, :]) - 2.0 * xy           # (Bt, TN, S)
        rowmin_ref[...] = jnp.minimum(rowmin_ref[...], jnp.min(sq, axis=-1))
        colmin_ref[s] = jnp.minimum(colmin_ref[s], jnp.min(sq, axis=1))

    _for_each_strip(n_strips, strip_step)

    # Vector accumulation of sqrt(row mins); cross-lane reduce deferred to the
    # last row tile.
    rowacc_ref[...] += jnp.sqrt(jnp.maximum(rowmin_ref[...], 0.0))

    @pl.when(n == n_last)
    def _():
        col_sum = jnp.sum(jnp.sqrt(jnp.maximum(colmin_ref[...], 0.0)))
        total = jnp.sum(rowacc_ref[...]) + col_sum
        out_ref[...] = jnp.broadcast_to(total, out_ref.shape).astype(out_ref.dtype)


def _largest_divisor(n, cap):
    """Largest divisor of n that is <= cap, preferring 128- then 8-multiples."""
    if n <= cap:
        return n
    for step in (128, 8):
        c = (cap // step) * step
        while c >= step:
            if n % c == 0:
                return c
            c -= step
    for c in range(cap, 63, -1):       # any reasonably wide divisor
        if n % c == 0:
            return c
    # TODO(synk): masked (pl.cdiv) strips for awkward M; fall back to one full
    # strip (TN is shrunk accordingly so the per-strip temp stays bounded).
    return n


def _largest_mult8_divisor(n, cap):
    c = (cap // 8) * 8
    while c >= 8:
        if n % c == 0:
            return c
        c -= 8
    return None


def _choose_tiles(B, N, M):
    """Pick (batch group Bt, row tile TN, lane strip S).

    With strip mining the live intermediates are O(Bt*TN*S) per strip plus the
    resident y block (Bt*Dp*M) and col-min/yy scratch (2*Bt*M), so the budget
    below keeps the footprint at a few MiB — far under the 32 MiB
    vmem_limit_bytes we request (v5e's *default* scoped VMEM is only 16 MiB,
    v7x's physical VMEM is 64 MiB).
    """
    # Strip over the M (lane) axis: divisor of M, target ~512 lanes.
    strip = _largest_divisor(M, 512)

    # Row tile: multiple of 8 dividing N (or N itself); keep TN*S <= ~256K f32
    # elements so per-strip intermediates stay ~1 MiB.
    tn_cap = max(8, min(512, (256 * 1024) // strip))
    if N <= tn_cap:
        tn = N
    else:
        tn = _largest_mult8_divisor(N, tn_cap) or N
        # TODO(synk): cdiv grid + in-kernel row masking for N with no
        # multiple-of-8 divisor (the TN = N fallback can exceed the budget).

    # Batch grouping: amortize the ~0.35us per-grid-step overhead for small
    # clouds while keeping G = B // Bt >= 2 so both v7x TensorCores get work.
    bt = 1
    if tn == N and B >= 4:
        for cand in range(2, B // 2 + 1):
            if (B % cand == 0
                    and cand * N * strip <= 512 * 1024     # per-strip temps
                    and cand * M <= 128 * 1024):           # resident y/colmin
                bt = cand
    return bt, tn, strip


@functools.partial(jax.jit, static_argnames=("weight",))
def recon_loss_ori(coords_ori, point_cloud_1, weight=1.0):
    """Pallas implementation of Recon_loss_ori.forward."""
    B, N, D = coords_ori.shape
    B2, M, D2 = point_cloud_1.shape
    assert B == B2 and D == D2
    assert N == M, "elementwise add of row/col mins requires N == M (as in torch)"

    bt, tn, strip = _choose_tiles(B, N, M)
    G, NT, Sn = B // bt, N // tn, M // strip

    # Pad the tiny feature dim to a multiple of 8 so the D-contraction is a
    # clean MXU matmul (K=3 risks a VPU multiply-add expansion).
    Dp = max(8, -(-D // 8) * 8)
    x = coords_ori.astype(jnp.float32)
    y = point_cloud_1.astype(jnp.float32)
    if Dp != D:
        pad = ((0, 0), (0, 0), (0, Dp - D))
        x = jnp.pad(x, pad)
        y = jnp.pad(y, pad)

    # Lane-dense, strip-major layout for the second cloud: (B, Sn, Dp, S).
    # M sits on the lane axis inside each strip; strips are selected with a
    # cheap leading-axis index in-kernel (no dynamic lane slicing).
    yS = jnp.transpose(jnp.transpose(y, (0, 2, 1)).reshape(B, Dp, Sn, strip),
                       (0, 2, 1, 3))

    kernel = functools.partial(_recon_loss_kernel, n_strips=Sn)

    partials = pl.pallas_call(
        kernel,
        out_shape=jax.ShapeDtypeStruct((G, 8, 128), jnp.float32),
        grid_spec=pltpu.PrefetchScalarGridSpec(
            num_scalar_prefetch=0,
            grid=(G, NT),
            in_specs=[
                pl.BlockSpec((bt, tn, Dp), lambda g, n: (g, n, 0)),
                pl.BlockSpec((bt, Sn, Dp, strip), lambda g, n: (g, 0, 0, 0)),
            ],
            out_specs=pl.BlockSpec((1, 8, 128), lambda g, n: (g, 0, 0)),
            scratch_shapes=[
                pltpu.VMEM((Sn, bt, strip), jnp.float32),   # running col mins (sq)
                pltpu.VMEM((Sn, bt, strip), jnp.float32),   # ||y||^2 per strip
                pltpu.VMEM((bt, tn), jnp.float32),          # row mins (sq), per tile
                pltpu.VMEM((bt, tn), jnp.float32),          # accumulated sqrt(row mins)
            ],
        ),
        compiler_params=pltpu.CompilerParams(
            # batch groups shard across TensorCores (v7x); the row-tile axis
            # carries the col-min / accumulator reduction.
            dimension_semantics=("parallel", "arbitrary"),
            vmem_limit_bytes=32 * 1024 * 1024,
        ),
    )(x, yS)

    # Sum per-group partials in the wrapper, then mean over the (B, N)
    # elements of (row_min + col_min) and scale by weight.
    total = jnp.sum(partials[:, 0, 0])
    return total / (B * N) * weight


def _reference(coords_ori, point_cloud_1, weight):
    """Pure-JAX reference mirroring torch.cdist + mins + mean."""
    diff = coords_ori[:, :, None, :] - point_cloud_1[:, None, :, :]   # (B,N,M,D)
    dist = jnp.sqrt(jnp.sum(diff * diff, axis=-1))                    # (B,N,M)
    return jnp.mean(jnp.min(dist, axis=-1) + jnp.min(dist, axis=-2)) * weight


if __name__ == "__main__":
    key = jax.random.PRNGKey(0)
    k1, k2 = jax.random.split(key)

    B, N, D = 2, 64, 3          # small point clouds, N == M
    WEIGHT = 0.5                # deterministic "weight" ctor arg

    coords_ori = jax.random.normal(k1, (B, N, D), dtype=jnp.float32)
    point_cloud_1 = jax.random.normal(k2, (B, N, D), dtype=jnp.float32)

    loss = recon_loss_ori(coords_ori, point_cloud_1, weight=WEIGHT)
    loss = jax.block_until_ready(loss)

    ref = _reference(coords_ori, point_cloud_1, WEIGHT)
    assert jnp.allclose(loss, ref, rtol=1e-3, atol=1e-3), (loss, ref)

    print("KERNEL_OK")
</pallas_src>

<mosaic_0001>
module attributes {stable_mosaic.version = 11 : i64} {
  func.func @_recon_loss_kernel(%arg0: i32, %arg1: i32, %arg2: memref<1x64x8xf32, #tpu.memory_space<vmem>>, %arg3: memref<1x1x8x64xf32, #tpu.memory_space<vmem>>, %arg4: memref<1x8x128xf32, #tpu.memory_space<vmem>>, %arg5: memref<1x1x64xf32, #tpu.memory_space<vmem>>, %arg6: memref<1x1x64xf32, #tpu.memory_space<vmem>>, %arg7: memref<1x64xf32, #tpu.memory_space<vmem>>, %arg8: memref<1x64xf32, #tpu.memory_space<vmem>>) attributes {dimension_semantics = [#tpu.dimension_semantics<parallel>, #tpu.dimension_semantics<arbitrary>], iteration_bounds = array<i64: 2, 1>, scalar_prefetch = 0 : i64, scratch_operands = 4 : i64, tpu.core_type = #tpu.core_type<tc>, window_params = [{transform_indices = @transform_0, window_bounds = array<i64: 1, 64, 8>}, {transform_indices = @transform_1, window_bounds = array<i64: 1, 1, 8, 64>}, {transform_indices = @transform_2, window_bounds = array<i64: 1, 8, 128>}]} {
    %c0_i32 = arith.constant 0 : i32
    %0 = arith.cmpi eq, %arg1, %c0_i32 : i32
    %1 = arith.extui %0 : i1 to i32
    %c0_i32_0 = arith.constant 0 : i32
    %2 = arith.cmpi ne, %1, %c0_i32_0 : i32
    scf.if %2 {
      %cst_36 = arith.constant 0x7F800000 : f32
      %42 = vector.broadcast %cst_36 : f32 to vector<1x1x64xf32>
      %c0_37 = arith.constant 0 : index
      %c0_38 = arith.constant 0 : index
      %c0_39 = arith.constant 0 : index
      %43 = vector.load %arg5[%c0_37, %c0_38, %c0_39] : memref<1x1x64xf32, #tpu.memory_space<vmem>>, vector<1x1x64xf32>
      tpu.vector_store %arg5[%c0_37, %c0_38, %c0_39], %42 {strides = array<i32>} : memref<1x1x64xf32, #tpu.memory_space<vmem>>, vector<1x1x64xf32>,
      %cst_40 = arith.constant 0.000000e+00 : f32
      %44 = vector.broadcast %cst_40 : f32 to vector<1x64xf32>
      %c0_41 = arith.constant 0 : index
      %c0_42 = arith.constant 0 : index
      %45 = vector.load %arg8[%c0_41, %c0_42] : memref<1x64xf32, #tpu.memory_space<vmem>>, vector<1x64xf32>
      tpu.vector_store %arg8[%c0_41, %c0_42], %44 {strides = array<i32>} : memref<1x64xf32, #tpu.memory_space<vmem>>, vector<1x64xf32>,
      %c0_43 = arith.constant 0 : index
      %c0_44 = arith.constant 0 : index
      %c0_45 = arith.constant 0 : index
      %c0_46 = arith.constant 0 : index
      %46 = vector.load %arg3[%c0_43, %c0_44, %c0_45, %c0_46] : memref<1x1x8x64xf32, #tpu.memory_space<vmem>>, vector<1x1x8x64xf32>
      %47 = vector.shape_cast %46 : vector<1x1x8x64xf32> to vector<1x8x64xf32>
      %48 = arith.mulf %47, %47 : vector<1x8x64xf32>
      %cst_47 = arith.constant dense<0.000000e+00> : vector<1x64xf32>
      %49 = vector.multi_reduction <add>, %48, %cst_47 [1] : vector<1x8x64xf32> to vector<1x64xf32>
      %c0_48 = arith.constant 0 : index
      %c0_49 = arith.constant 0 : index
      %c0_50 = arith.constant 0 : index
      %50 = vector.load %arg6[%c0_48, %c0_49, %c0_50] : memref<1x1x64xf32, #tpu.memory_space<vmem>>, vector<1x1x64xf32>
      %51 = vector.shape_cast %50 : vector<1x1x64xf32> to vector<1x64xf32>
      %52 = vector.shape_cast %49 : vector<1x64xf32> to vector<1x1x64xf32>
      tpu.vector_store %arg6[%c0_48, %c0_49, %c0_50], %52 {strides = array<i32>} : memref<1x1x64xf32, #tpu.memory_space<vmem>>, vector<1x1x64xf32>,
    } else {
    }
    %c0 = arith.constant 0 : index
    %c0_1 = arith.constant 0 : index
    %c0_2 = arith.constant 0 : index
    %3 = vector.load %arg2[%c0, %c0_1, %c0_2] : memref<1x64x8xf32, #tpu.memory_space<vmem>>, vector<1x64x8xf32>
    %4 = arith.mulf %3, %3 : vector<1x64x8xf32>
    %cst = arith.constant dense<0.000000e+00> : vector<1x64xf32>
    %5 = vector.multi_reduction <add>, %4, %cst [2] : vector<1x64x8xf32> to vector<1x64xf32>
    %6 = vector.shape_cast %5 : vector<1x64xf32> to vector<1x64x1xf32>
    %cst_3 = arith.constant 0x7F800000 : f32
    %7 = vector.broadcast %cst_3 : f32 to vector<1x64xf32>
    %c0_4 = arith.constant 0 : index
    %c0_5 = arith.constant 0 : index
    %8 = vector.load %arg7[%c0_4, %c0_5] : memref<1x64xf32, #tpu.memory_space<vmem>>, vector<1x64xf32>
    tpu.vector_store %arg7[%c0_4, %c0_5], %7 {strides = array<i32>} : memref<1x64xf32, #tpu.memory_space<vmem>>, vector<1x64xf32>,
    %c0_6 = arith.constant 0 : index
    %c0_7 = arith.constant 0 : index
    %c0_8 = arith.constant 0 : index
    %c0_9 = arith.constant 0 : index
    %9 = vector.load %arg3[%c0_6, %c0_7, %c0_8, %c0_9] : memref<1x1x8x64xf32, #tpu.memory_space<vmem>>, vector<1x1x8x64xf32>
    %10 = vector.shape_cast %9 : vector<1x1x8x64xf32> to vector<1x8x64xf32>
    "tpu.trace_start"() <{level = 10 : i32, message = "bnd,bds->bns"}> : () -> ()
    %cst_10 = arith.constant dense<0.000000e+00> : vector<1x64x64xf32>
    %11 = tpu.matmul %3, %10, %cst_10 {dimension_numbers = #tpu.dot_dimension_numbers<[2], [1], [1], [2], [0, 0, 0, 1, 1, 2], [0], [0]>} : vector<1x64x8xf32>, vector<1x8x64xf32>, vector<1x64x64xf32> -> vector<1x64x64xf32>
    "tpu.trace_stop"() : () -> ()
    %c0_11 = arith.constant 0 : index
    %c0_12 = arith.constant 0 : index
    %c0_13 = arith.constant 0 : index
    %12 = vector.load %arg6[%c0_11, %c0_12, %c0_13] : memref<1x1x64xf32, #tpu.memory_space<vmem>>, vector<1x1x64xf32>
    %13 = vector.shape_cast %12 : vector<1x1x64xf32> to vector<1x64xf32>
    %14 = vector.shape_cast %13 : vector<1x64xf32> to vector<1x1x64xf32>
    %15 = vector.broadcast %6 : vector<1x64x1xf32> to vector<1x64x64xf32>
    %16 = vector.broadcast %14 : vector<1x1x64xf32> to vector<1x64x64xf32>
    %17 = arith.addf %15, %16 : vector<1x64x64xf32>
    %cst_14 = arith.constant 2.000000e+00 : f32
    %18 = vector.broadcast %cst_14 : f32 to vector<1x64x64xf32>
    %19 = arith.mulf %18, %11 : vector<1x64x64xf32>
    %20 = arith.subf %17, %19 : vector<1x64x64xf32>
    %c0_15 = arith.constant 0 : index
    %c0_16 = arith.constant 0 : index
    %21 = vector.load %arg7[%c0_15, %c0_16] : memref<1x64xf32, #tpu.memory_space<vmem>>, vector<1x64xf32>
    %cst_17 = arith.constant dense<0x7F800000> : vector<1x64xf32>
    %22 = vector.multi_reduction <minimumf>, %20, %cst_17 [2] : vector<1x64x64xf32> to vector<1x64xf32>
    %23 = arith.minimumf %21, %22 : vector<1x64xf32>
    %c0_18 = arith.constant 0 : index
    %c0_19 = arith.constant 0 : index
    %24 = vector.load %arg7[%c0_18, %c0_19] : memref<1x64xf32, #tpu.memory_space<vmem>>, vector<1x64xf32>
    tpu.vector_store %arg7[%c0_18, %c0_19], %23 {strides = array<i32>} : memref<1x64xf32, #tpu.memory_space<vmem>>, vector<1x64xf32>,
    %c0_20 = arith.constant 0 : index
    %c0_21 = arith.constant 0 : index
    %c0_22 = arith.constant 0 : index
    %25 = vector.load %arg5[%c0_20, %c0_21, %c0_22] : memref<1x1x64xf32, #tpu.memory_space<vmem>>, vector<1x1x64xf32>
    %26 = vector.shape_cast %25 : vector<1x1x64xf32> to vector<1x64xf32>
    %cst_23 = arith.constant dense<0x7F800000> : vector<1x64xf32>
    %27 = vector.multi_reduction <minimumf>, %20, %cst_23 [1] : vector<1x64x64xf32> to vector<1x64xf32>
    %28 = arith.minimumf %26, %27 : vector<1x64xf32>
    %c0_24 = arith.constant 0 : index
    %c0_25 = arith.constant 0 : index
    %c0_26 = arith.constant 0 : index
    %29 = vector.load %arg5[%c0_24, %c0_25, %c0_26] : memref<1x1x64xf32, #tpu.memory_space<vmem>>, vector<1x1x64xf32>
    %30 = vector.shape_cast %29 : vector<1x1x64xf32> to vector<1x64xf32>
    %31 = vector.shape_cast %28 : vector<1x64xf32> to vector<1x1x64xf32>
    tpu.vector_store %arg5[%c0_24, %c0_25, %c0_26], %31 {strides = array<i32>} : memref<1x1x64xf32, #tpu.memory_space<vmem>>, vector<1x1x64xf32>,
    %c0_27 = arith.constant 0 : index
    %c0_28 = arith.constant 0 : index
    %32 = vector.load %arg8[%c0_27, %c0_28] : memref<1x64xf32, #tpu.memory_space<vmem>>, vector<1x64xf32>
    %c0_29 = arith.constant 0 : index
    %c0_30 = arith.constant 0 : index
    %33 = vector.load %arg7[%c0_29, %c0_30] : memref<1x64xf32, #tpu.memory_space<vmem>>, vector<1x64xf32>
    %cst_31 = arith.constant 0.000000e+00 : f32
    %34 = vector.broadcast %cst_31 : f32 to vector<1x64xf32>
    %35 = arith.maximumf %33, %34 : vector<1x64xf32>
    %36 = math.sqrt %35 : vector<1x64xf32>
    %37 = arith.addf %32, %36 : vector<1x64xf32>
    %c0_32 = arith.constant 0 : index
    %c0_33 = arith.constant 0 : index
    %38 = vector.load %arg8[%c0_32, %c0_33] : memref<1x64xf32, #tpu.memory_space<vmem>>, vector<1x64xf32>
    tpu.vector_store %arg8[%c0_32, %c0_33], %37 {strides = array<i32>} : memref<1x64xf32, #tpu.memory_space<vmem>>, vector<1x64xf32>,
    %c0_i32_34 = arith.constant 0 : i32
    %39 = arith.cmpi eq, %arg1, %c0_i32_34 : i32
    %40 = arith.extui %39 : i1 to i32
    %c0_i32_35 = arith.constant 0 : i32
    %41 = arith.cmpi ne, %40, %c0_i32_35 : i32
    scf.if %41 {
      %c0_36 = arith.constant 0 : index
      %c0_37 = arith.constant 0 : index
      %c0_38 = arith.constant 0 : index
      %42 = vector.load %arg5[%c0_36, %c0_37, %c0_38] : memref<1x1x64xf32, #tpu.memory_space<vmem>>, vector<1x1x64xf32>
      %cst_39 = arith.constant 0.000000e+00 : f32
      %43 = vector.broadcast %cst_39 : f32 to vector<1x1x64xf32>
      %44 = arith.maximumf %42, %43 : vector<1x1x64xf32>
      %45 = math.sqrt %44 : vector<1x1x64xf32>
      %46 = vector.shape_cast %45 : vector<1x1x64xf32> to vector<1x1x1x64xf32>
      %cst_40 = arith.constant dense<0.000000e+00> : vector<1xf32>
      %47 = vector.multi_reduction <add>, %46, %cst_40 [1, 2, 3] : vector<1x1x1x64xf32> to vector<1xf32>
      %48 = vector.shape_cast %47 : vector<1xf32> to vector<1x1x1x1xf32>
      %49 = vector.extract %48[0, 0, 0, 0] : f32 from vector<1x1x1x1xf32>
      %c0_41 = arith.constant 0 : index
      %c0_42 = arith.constant 0 : index
      %50 = vector.load %arg8[%c0_41, %c0_42] : memref<1x64xf32, #tpu.memory_space<vmem>>, vector<1x64xf32>
      %51 = vector.shape_cast %50 : vector<1x64xf32> to vector<1x1x64xf32>
      %cst_43 = arith.constant dense<0.000000e+00> : vector<1xf32>
      %52 = vector.multi_reduction <add>, %51, %cst_43 [1, 2] : vector<1x1x64xf32> to vector<1xf32>
      %53 = vector.shape_cast %52 : vector<1xf32> to vector<1x1x1xf32>
      %54 = vector.extract %53[0, 0, 0] : f32 from vector<1x1x1xf32>
      %55 = arith.addf %54, %49 : f32
      %56 = vector.broadcast %55 : f32 to vector<1x8x128xf32>
      %c0_44 = arith.constant 0 : index
      %c0_45 = arith.constant 0 : index
      %c0_46 = arith.constant 0 : index
      %57 = vector.load %arg4[%c0_44, %c0_45, %c0_46] : memref<1x8x128xf32, #tpu.memory_space<vmem>>, vector<1x8x128xf32>
      tpu.vector_store %arg4[%c0_44, %c0_45, %c0_46], %56 {strides = array<i32>} : memref<1x8x128xf32, #tpu.memory_space<vmem>>, vector<1x8x128xf32>,
    } else {
    }
    return
  }
  func.func @transform_0(%arg0: i32, %arg1: i32) -> (i32, i32, i32) {
    %c0_i32 = arith.constant 0 : i32
    %c0_i32_0 = arith.constant 0 : i32
    return %arg0, %arg1, %c0_i32 : i32, i32, i32
  }
  func.func @transform_1(%arg0: i32, %arg1: i32) -> (i32, i32, i32, i32) {
    %c0_i32 = arith.constant 0 : i32
    %c0_i32_0 = arith.constant 0 : i32
    %c0_i32_1 = arith.constant 0 : i32
    %c0_i32_2 = arith.constant 0 : i32
    return %arg0, %c0_i32, %c0_i32_0, %c0_i32_1 : i32, i32, i32, i32
  }
  func.func @transform_2(%arg0: i32, %arg1: i32) -> (i32, i32, i32) {
    %c0_i32 = arith.constant 0 : i32
    %c0_i32_0 = arith.constant 0 : i32
    %c0_i32_1 = arith.constant 0 : i32
    return %arg0, %c0_i32, %c0_i32_0 : i32, i32, i32
  }
}

</mosaic_0001>

<bundles_post_ra>
// kernel: recon_loss_ori.1
= control target key start
LH: loop header
LB: loop body
LE: loop exit
PB: predicated region body
PF: predicated region fallthrough
CT: control target
= control target key end

     0   :  { %s1457_s9 = smov 0   ;;  %s1459_s10 = smov 0   ;;  %s1698_s0 = inlined_call_operand.vmem [shape: f32[2,64,8], index: 0, kind: input, shape index: {}]   ;;  %s1699_s1 = inlined_call_operand.vmem [shape: f32[2,1,8,64], index: 1, kind: input, shape index: {}]   ;;  %s1700_s2 = inlined_call_operand.vmem [shape: f32[2,8,128], index: 2, kind: output, shape index: {}]  }
   0x1   :  { %s1461_s11 = smov 0  }
   0x2 LB: > { %s24_s12 = sadd.s32 1, %s1432_s10  ;;  %p1334_p0 = scmp.ge.s32.totalorder %s1436_s11, 1  ;;  %s1436_s11 = sphi %s1461_s11, %s12_s11   ;;  %s1432_s10 = sphi %s1459_s10, %s1702_s10   ;;  %s1428_s9 = sphi %s1457_s9, %s1701_s9  }
   0x3   : > { %p26_p1 = scmp.ge.s32.totalorder %s24_s12, 2  ;;  %p140_p2 = scmp.lt.s32.totalorder %s1436_s11, 3 }
   0x5   : > { %s1704_s12 = smov (%p26_p1, %s24_s12), 0  ;;  %p141_p3 = pnand %p1334_p0, %p140_p2 }
   0x6   : > { %p170_p4 = scmp.lt.s32.totalorder (!%p141_p3), %s1428_s9, 1 }
   0x7   : > { %144 = sbr.rel (%p141_p3) target bundleno = 780 (0x30c), region = 28 }
   0xc   : > { %s1706_s9 = smov (!%p170_p4, %s1428_s9), 1  ;;  %vm196_vm0 = vcmask 523264   ;;  %vm221_vm1 = vcmask 64512   ;;  %vm191_vm2 = vcmask 516096   ;;  %v1438_v33 = vmov inf  }
   0xd   : > { %s1350_s13 = sshll.u32 %s1706_s9, 6  ;;  %s1337_s14 = sshll.u32 %s1706_s9, 3  ;;  %192 = vst.msk [vmem:[#allocation2] sm:$0x1] %vm191_vm2, %v1438_v33  ;;  %247 = vst.msk [vmem:[#allocation4] sm:$0x1] %vm191_vm2, %v1438_v33 }
   0xe   : > { %s1482_s17 = scalar_lea.vmem %s1698_s0, %s1350_s13  ;;  %s182_s20 = scalar_lea.vmem %s1699_s1, %s1337_s14  ;;  %vm1126_vm5 = vcmask 130112   ;;  %vm1133_vm6 = vcmask 195712   ;;  %vm1140_vm7 = vcmask 261312   ;;  %vm1147_vm8 = vcmask 326912  }
   0xf   : > { %v194_v0 = vld [vmem:[%s182_s20] sm:$0xff]  ;;  %v206_v5 = vld [vmem:[%s1482_s17 + $0x8] sm:$0xff]  ;;  %v207_v7 = vld [vmem:[%s1482_s17 + $0x10] sm:$0xff]  ;;  %vm1154_vm9 = vcmask 392512   ;;  %vm1161_vm10 = vcmask 458112   ;;  %vm1168_vm11 = vcmask 523712   ;;  %s186_s25 = scalar_lea.vmem %s1700_s2, %s1337_s14 }
  0x10   : > { %v205_v1 = vld [vmem:[%s1482_s17] sm:$0xff]  ;;  %v195_v3 = vmul.f32 %v194_v0, %v194_v0  ;;  %1360 = vmatprep.subr.mxu0 %v194_v0  ;;  %1374 = vmatprep.subr.mxu1 %v194_v0  ;;  %v210_v6 = vld [vmem:[%s1482_s17 + $0x28] sm:$0xff]  ;;  %v211_v8 = vld [vmem:[%s1482_s17 + $0x30] sm:$0xff]  ;;  %v215_v10 = vmul.f32 %v207_v7, %v207_v7  ;;  %v214_v14 = vmul.f32 %v206_v5, %v206_v5 }
  0x11   : > { %v209_v2 = vld [vmem:[%s1482_s17 + $0x20] sm:$0xff]  ;;  %v213_v4 = vmul.f32 %v205_v1, %v205_v1  ;;  %1361 = vmatpush3.msra.mxu0 %v194_v0  ;;  %1375 = vmatpush3.msra.mxu1 %v194_v0  ;;  %v208_v9 = vld [vmem:[%s1482_s17 + $0x18] sm:$0xff]  ;;  %v218_v22 = vmul.f32 %v210_v6, %v210_v6  ;;  %v219_v28 = vmul.f32 %v211_v8, %v211_v8 }
  0x12   : > { %v197_v11 = vsel %vm196_vm0, %v195_v3, 0.0  ;;  %1362 = vmatprep.mubr.msk.f32.mxu0 %vm221_vm1, %v205_v1  ;;  %1368 = vmatprep.mubr.msk.f32.mxu1 %vm221_vm1, %v209_v2  ;;  %v216_v13 = vmul.f32 %v208_v9, %v208_v9  ;;  %v228_v16 = vsel %vm221_vm1, %v215_v10, 0.0  ;;  %v212_v17 = vld [vmem:[%s1482_s17 + $0x38] sm:$0xff]  ;;  %v217_v19 = vmul.f32 %v209_v2, %v209_v2 }
  0x13   : > { %v222_v12 = vsel %vm221_vm1, %v213_v4, 0.0  ;;  %v198_v15 = vrot.slane %v197_v11, 4  ;;  %1363 = vmatmul.mubr.msk.f32.vlgmr.msra.gmra.mxu0 %vm221_vm1, %v206_v5  ;;  %1369 = vmatmul.mubr.msk.f32.vlgmr.msra.gmra.mxu1 %vm221_vm1, %v210_v6  ;;  %v225_v21 = vsel %vm221_vm1, %v214_v14, 0.0  ;;  %v237_v25 = vsel %vm221_vm1, %v218_v22, 0.0 }
  0x14   : > { %1365 = vmatprep.mubr.msk.f32.mxu0 %vm221_vm1, %v207_v7  ;;  %1371 = vmatprep.mubr.msk.f32.mxu1 %vm221_vm1, %v211_v8  ;;  %v231_v20 = vsel %vm221_vm1, %v216_v13, 0.0  ;;  %v234_v26 = vsel %vm221_vm1, %v217_v19, 0.0  ;;  %v220_v27 = vmul.f32 %v212_v17, %v212_v17  ;;  %v240_v32 = vsel %vm221_vm1, %v219_v28, 0.0 }
  0x15   : > { %v199_v18 = vadd.f32 %v198_v15, %v197_v11  ;;  %229 = vadd.xlane.f32.xlu1 %v228_v16  ;;  %223 = vadd.xlane.f32.xlu0 %v222_v12 }
  0x16   : > { %v243_v31 = vsel %vm221_vm1, %v220_v27, 0.0 }
  0x17   : > { %v200_v23 = vrot.slane %v199_v18, 2  ;;  %1366 = vmatmul.mubr.msk.f32.gmra.mxu0 %vm221_vm1, %v208_v9  ;;  %1372 = vmatmul.mubr.msk.f32.gmra.mxu1 %vm221_vm1, %v212_v17 }
  0x19   : > { %v201_v24 = vadd.f32 %v200_v23, %v199_v18  ;;  %232 = vadd.xlane.f32.xlu1 %v231_v20  ;;  %226 = vadd.xlane.f32.xlu0 %v225_v21 }
  0x1b   : > { %v202_v29 = vrot.slane %v201_v24, 1 }
  0x1d   : > { %v203_v30 = vadd.f32 %v202_v29, %v201_v24  ;;  %238 = vadd.xlane.f32.xlu1 %v237_v25  ;;  %235 = vadd.xlane.f32.xlu0 %v234_v26 }
  0x1f   : > { %204 = vst.msk [vmem:[#allocation3] sm:$0x1] %vm191_vm2, %v203_v30 }
  0x21   : > { %244 = vadd.xlane.f32.xlu1 %v243_v31  ;;  %241 = vadd.xlane.f32.xlu0 %v240_v32  ;;  %v1439_v31 = vmov 0   ;;  %v1187_v32 = vld [vmem:[#allocation2] sm:$0x1] }
  0x22   : > { %1409 = vset.pattern.permute.xlu1 %v1439_v31  ;;  %1408 = vset.pattern.permute.xlu0 %v1439_v31 }
  0x26   : > { %v1347_v40 = vld [vmem:[#allocation3] ss:$0 sm:$0xff] }
  0x9e   : > { %v230_v34 = vpop.xlane.xlu1 %229  ;;  %v224_v35 = vpop.xlane.xlu0 %223 }
  0x9f   : > { %v385_v52 = vadd.f32 %v1347_v40, %v224_v35  ;;  %v387_v5 = vadd.f32 %v1347_v40, %v230_v34  ;;  %v443_v35 = vlaneseq }
  0xa2   : > { %v233_v36 = vpop.xlane.xlu1 %232  ;;  %v227_v37 = vpop.xlane.xlu0 %226 }
  0xa3   : > { %v386_v41 = vadd.f32 %v1347_v40, %v227_v37  ;;  %v388_v1 = vadd.f32 %v1347_v40, %v233_v36  ;;  %v1440_v36 = vmov 1966171168  }
  0xa4   : > { %v704_v37 = vunpack.c.l.s4 %v1440_v36 }
  0xa6   : > { %v239_v38 = vpop.xlane.xlu1 %238  ;;  %v236_v39 = vpop.xlane.xlu0 %235 }
  0xa7   : > { %v390_v43 = vadd.f32 %v1347_v40, %v239_v38  ;;  %v389_v51 = vadd.f32 %v1347_v40, %v236_v39  ;;  %v1527_v38 = vshrl.u32 %v443_v35, 7  ;;  %v705_v39 = vunpack.c.0.s8 %v704_v37 }
  0xaa   : > { %v245_v47 = vpop.xlane.xlu1 %244  ;;  %v242_v48 = vpop.xlane.xlu0 %241 }
  0xab   : > { %v392_v57 = vadd.f32 %v1347_v40, %v245_v47  ;;  %v391_v59 = vadd.f32 %v1347_v40, %v242_v48  ;;  %v1530_v40 = vsub.s32 0, %v1527_v38  ;;  %v1551_v47 = vsub.s32 7, %v1527_v38 }
  0xd3   : > { %v1370_v42 = vpop.f32.mrf.mxu1  ;;  %v1364_v44 = vpop.f32.mrf.mxu0 }
  0xd4   : > { %v398_v45 = vmul.f32 2.0, %v1370_v42  ;;  %v394_v46 = vmul.f32 2.0, %v1364_v44  ;;  %v1536_v42 = vsub.s32 2, %v1527_v38  ;;  %v1542_v44 = vsub.s32 4, %v1527_v38 }
  0xd5   : > { %v339_v49 = vpop.f32.mrf.mxu0  ;;  %v359_v50 = vpop.f32.mrf.mxu1 }
  0xd6   : > { %v393_v53 = vmul.f32 2.0, %v339_v49  ;;  %v397_v54 = vmul.f32 2.0, %v359_v50  ;;  %v402_v55 = vsub.f32 %v386_v41, %v394_v46  ;;  %v406_v60 = vsub.f32 %v390_v43, %v398_v45 }
  0xd7   : > { %v1373_v56 = vpop.f32.mrf.mxu1  ;;  %v1367_v58 = vpop.f32.mrf.mxu0  ;;  %v1533_v41 = vsub.s32 1, %v1527_v38  ;;  %v1539_v43 = vsub.s32 3, %v1527_v38  ;;  %v1545_v45 = vsub.s32 5, %v1527_v38  ;;  %v1548_v46 = vsub.s32 6, %v1527_v38 }
  0xd8   : > { %v400_v61 = vmul.f32 2.0, %v1373_v56  ;;  %v396_v62 = vmul.f32 2.0, %v1367_v58  ;;  %v414_v63 = vsel %vm196_vm0, %v402_v55, inf  ;;  %v401_v0 = vsub.f32 %v385_v52, %v393_v53 }
  0xd9   : > { %v349_v2 = vpop.f32.mrf.mxu0  ;;  %v369_v3 = vpop.f32.mrf.mxu1  ;;  %415 = vmin.xlane.f32.xlu1 %v414_v63  ;;  %v405_v4 = vsub.f32 %v389_v51, %v397_v54  ;;  %v426_v13 = vsel %vm196_vm0, %v406_v60, inf  ;;  %v1554_v49 = vsub.s32 %v705_v39, %v1527_v38 }
  0xda   : > { %v395_v6 = vmul.f32 2.0, %v349_v2  ;;  %v399_v7 = vmul.f32 2.0, %v369_v3  ;;  %v411_v8 = vsel %vm196_vm0, %v401_v0, inf  ;;  %v404_v10 = vsub.f32 %v388_v1, %v396_v62 }
  0xdb   : > { %412 = vmin.xlane.f32.xlu0 %v411_v8  ;;  %v423_v9 = vsel %vm196_vm0, %v405_v4, inf  ;;  %v408_v11 = vsub.f32 %v392_v57, %v400_v61  ;;  %v1189_v20 = vmin.f32 %v414_v63, %v426_v13 }
  0xdc   : > { %v403_v12 = vsub.f32 %v387_v5, %v395_v6  ;;  %v407_v14 = vsub.f32 %v391_v59, %v399_v7  ;;  %v1188_v15 = vmin.f32 %v411_v8, %v423_v9  ;;  %v420_v16 = vsel %vm196_vm0, %v404_v10, inf }
  0xdd   : > { %427 = vmin.xlane.f32.xlu1 %v426_v13  ;;  %v432_v17 = vsel %vm196_vm0, %v408_v11, inf }
  0xde   : > { %v417_v18 = vsel %vm196_vm0, %v403_v12, inf  ;;  %v429_v19 = vsel %vm196_vm0, %v407_v14, inf  ;;  %v1191_v21 = vmin.f32 %v420_v16, %v432_v17  ;;  %v1192_v23 = vmin.f32 %v1188_v15, %v1189_v20 }
  0xdf   : > { %424 = vmin.xlane.f32.xlu0 %v423_v9  ;;  %v1190_v22 = vmin.f32 %v417_v18, %v429_v19 }
  0xe1   : > { %421 = vmin.xlane.f32.xlu1 %v420_v16  ;;  %v1193_v24 = vmin.f32 %v1190_v22, %v1191_v21 }
  0xe3   : > { %418 = vmin.xlane.f32.xlu0 %v417_v18  ;;  %v1194_v25 = vmin.f32 %v1192_v23, %v1193_v24 }
  0xe5   : > { %433 = vmin.xlane.f32.xlu1 %v432_v17  ;;  %v1195_v26 = vrot.slane %v1194_v25, 4 }
  0xe7   : > { %430 = vmin.xlane.f32.xlu0 %v429_v19  ;;  %v1196_v27 = vmin.f32 %v1194_v25, %v1195_v26 }
  0xe9   : > { %v1197_v28 = vrot.slane %v1196_v27, 2 }
  0xeb   : > { %v1198_v29 = vmin.f32 %v1196_v27, %v1197_v28 }
  0xed   : > { %v1199_v30 = vrot.slane %v1198_v29, 1 }
  0xef   : > { %v1200_v33 = vmin.f32 %v1198_v29, %v1199_v30 }
  0xf1   : > { %v1201_v34 = vmin.f32 %v1187_v32, %v1200_v33 }
  0xf3   : > { %1202 = vst.msk [vmem:[#allocation2] sm:$0x1] %vm191_vm2, %v1201_v34 }
 0x162   : > { %v416_v48 = vpop.xlane.xlu1 %415 }
 0x163   : > { %v478_v50 = vrot.slane %v416_v48, %v1530_v40  ;;  %v482_v51 = vrot.slane %v416_v48, %v1533_v41  ;;  %v486_v52 = vrot.slane %v416_v48, %v1536_v42  ;;  %v490_v53 = vrot.slane %v416_v48, %v1539_v43 }
 0x164   : > { %v413_v54 = vpop.xlane.xlu0 %412  ;;  %v494_v55 = vrot.slane %v416_v48, %v1542_v44  ;;  %v498_v56 = vrot.slane %v416_v48, %v1545_v45  ;;  %v502_v57 = vrot.slane %v416_v48, %v1548_v46  ;;  %v506_v58 = vrot.slane %v416_v48, %v1551_v47 }
 0x165   : > { %v748_v59 = vcombine.low %v478_v50, %v482_v51  ;;  %v749_v60 = vcombine.low %v486_v52, %v490_v53  ;;  %v446_v61 = vrot.slane %v413_v54, %v1530_v40  ;;  %v450_v62 = vrot.slane %v413_v54, %v1533_v41 }
 0x166   : > { %v750_v63 = vcombine.low %v494_v55, %v498_v56  ;;  %v751_v0 = vcombine.low %v502_v57, %v506_v58  ;;  %v454_v1 = vrot.slane %v413_v54, %v1536_v42  ;;  %v458_v2 = vrot.slane %v413_v54, %v1539_v43  ;;  %v428_v3 = vpop.xlane.xlu1 %427 }
 0x167   : > { %v758_v4 = vrot.slane %v748_v59, %v1554_v49  ;;  %v765_v5 = vrot.slane %v749_v60, %v1554_v49  ;;  %v462_v6 = vrot.slane %v413_v54, %v1542_v44  ;;  %v466_v7 = vrot.slane %v413_v54, %v1545_v45 }
 0x168   : > { %v772_v8 = vrot.slane %v750_v63, %v1554_v49  ;;  %v779_v9 = vrot.slane %v751_v0, %v1554_v49  ;;  %v470_v10 = vrot.slane %v413_v54, %v1548_v46  ;;  %v474_v11 = vrot.slane %v413_v54, %v1551_v47  ;;  %v425_v24 = vpop.xlane.xlu0 %424 }
 0x169   : > { %v780_v12 = vcombine.low %v758_v4, %v765_v5  ;;  %v699_v13 = vcombine.low %v446_v61, %v450_v62  ;;  %v700_v14 = vcombine.low %v454_v1, %v458_v2  ;;  %v701_v15 = vcombine.low %v462_v6, %v466_v7 }
 0x16a   : > { %v781_v16 = vcombine.low %v772_v8, %v779_v9  ;;  %v702_v17 = vcombine.low %v470_v10, %v474_v11  ;;  %v606_v18 = vrot.slane %v428_v3, %v1530_v40  ;;  %v610_v19 = vrot.slane %v428_v3, %v1533_v41  ;;  %v422_v56 = vpop.xlane.xlu1 %421 }
 0x16b   : > { %v788_v20 = vrot.slane %v780_v12, %v1554_v49  ;;  %v709_v21 = vrot.slane %v699_v13, %v1554_v49  ;;  %v716_v22 = vrot.slane %v700_v14, %v1554_v49  ;;  %v723_v23 = vrot.slane %v701_v15, %v1554_v49 }
 0x16c   : > { %v795_v25 = vrot.slane %v781_v16, %v1554_v49  ;;  %v730_v26 = vrot.slane %v702_v17, %v1554_v49  ;;  %v614_v27 = vrot.slane %v428_v3, %v1536_v42  ;;  %v618_v28 = vrot.slane %v428_v3, %v1539_v43  ;;  %v419_v17 = vpop.xlane.xlu0 %418 }
 0x16d   : > { %v731_v29 = vcombine.low %v709_v21, %v716_v22  ;;  %v622_v30 = vrot.slane %v428_v3, %v1542_v44  ;;  %v626_v31 = vrot.slane %v428_v3, %v1545_v45  ;;  %v630_v32 = vrot.slane %v428_v3, %v1548_v46 }
 0x16e   : > { %v796_v33 = vcombine.low %v788_v20, %v795_v25  ;;  %v732_v34 = vcombine.low %v723_v23, %v730_v26  ;;  %v634_v36 = vrot.slane %v428_v3, %v1551_v47  ;;  %v944_v37 = vcombine.low %v606_v18, %v610_v19 }
 0x16f   : > { %v739_v39 = vrot.slane %v731_v29, %v1554_v49  ;;  %v945_v48 = vcombine.low %v614_v27, %v618_v28  ;;  %v946_v50 = vcombine.low %v622_v30, %v626_v31  ;;  %v574_v51 = vrot.slane %v425_v24, %v1530_v40 }
 0x170   : > { %1095 = vperm.xlu1 %1409, %v796_v33   ;;  %v746_v52 = vrot.slane %v732_v34, %v1554_v49  ;;  %v947_v53 = vcombine.low %v630_v32, %v634_v36  ;;  %v954_v54 = vrot.slane %v944_v37, %v1554_v49  ;;  %v578_v55 = vrot.slane %v425_v24, %v1533_v41 }
 0x171   : > { %v961_v57 = vrot.slane %v945_v48, %v1554_v49  ;;  %v968_v58 = vrot.slane %v946_v50, %v1554_v49  ;;  %v582_v59 = vrot.slane %v425_v24, %v1536_v42  ;;  %v586_v60 = vrot.slane %v425_v24, %v1539_v43  ;;  %v431_v48 = vpop.xlane.xlu0 %430 }
 0x172   : > { %v747_v61 = vcombine.low %v739_v39, %v746_v52  ;;  %v975_v62 = vrot.slane %v947_v53, %v1554_v49  ;;  %v590_v63 = vrot.slane %v425_v24, %v1542_v44  ;;  %v594_v0 = vrot.slane %v425_v24, %v1545_v45 }
 0x173   : > { %v976_v1 = vcombine.low %v954_v54, %v961_v57  ;;  %v598_v2 = vrot.slane %v425_v24, %v1548_v46  ;;  %v602_v3 = vrot.slane %v425_v24, %v1551_v47  ;;  %v895_v4 = vcombine.low %v574_v51, %v578_v55 }
 0x174   : > { %1092 = vperm.xlu0 %1408, %v747_v61   ;;  %v977_v5 = vcombine.low %v968_v58, %v975_v62  ;;  %v896_v6 = vcombine.low %v582_v59, %v586_v60  ;;  %v897_v7 = vcombine.low %v590_v63, %v594_v0  ;;  %v542_v8 = vrot.slane %v422_v56, %v1530_v40 }
 0x175   : > { %v984_v9 = vrot.slane %v976_v1, %v1554_v49  ;;  %v898_v10 = vcombine.low %v598_v2, %v602_v3  ;;  %v905_v11 = vrot.slane %v895_v4, %v1554_v49  ;;  %v546_v12 = vrot.slane %v422_v56, %v1533_v41 }
 0x176   : > { %v991_v13 = vrot.slane %v977_v5, %v1554_v49  ;;  %v912_v14 = vrot.slane %v896_v6, %v1554_v49  ;;  %v919_v15 = vrot.slane %v897_v7, %v1554_v49  ;;  %v550_v16 = vrot.slane %v422_v56, %v1536_v42  ;;  %v434_v6 = vpop.xlane.xlu1 %433 }
 0x177   : > { %v926_v18 = vrot.slane %v898_v10, %v1554_v49  ;;  %v554_v19 = vrot.slane %v422_v56, %v1539_v43  ;;  %v558_v20 = vrot.slane %v422_v56, %v1542_v44  ;;  %v562_v21 = vrot.slane %v422_v56, %v1545_v45 }
 0x178   : > { %v992_v22 = vcombine.low %v984_v9, %v991_v13  ;;  %v927_v23 = vcombine.low %v905_v11, %v912_v14  ;;  %v566_v24 = vrot.slane %v422_v56, %v1548_v46  ;;  %v570_v25 = vrot.slane %v422_v56, %v1551_v47 }
 0x179   : > { %v928_v26 = vcombine.low %v919_v15, %v926_v18  ;;  %v846_v27 = vcombine.low %v542_v8, %v546_v12  ;;  %v847_v28 = vcombine.low %v550_v16, %v554_v19  ;;  %v848_v29 = vcombine.low %v558_v20, %v562_v21 }
 0x17a   : > { %1107 = vperm.xlu1 %1409, %v992_v22   ;;  %v935_v30 = vrot.slane %v927_v23, %v1554_v49  ;;  %v849_v31 = vcombine.low %v566_v24, %v570_v25  ;;  %v510_v32 = vrot.slane %v419_v17, %v1530_v40  ;;  %v514_v33 = vrot.slane %v419_v17, %v1533_v41 }
 0x17b   : > { %v942_v34 = vrot.slane %v928_v26, %v1554_v49  ;;  %v856_v36 = vrot.slane %v846_v27, %v1554_v49  ;;  %v863_v37 = vrot.slane %v847_v28, %v1554_v49  ;;  %v870_v39 = vrot.slane %v848_v29, %v1554_v49 }
 0x17c   : > { %v877_v50 = vrot.slane %v849_v31, %v1554_v49  ;;  %v518_v51 = vrot.slane %v419_v17, %v1536_v42  ;;  %v522_v52 = vrot.slane %v419_v17, %v1539_v43  ;;  %v526_v53 = vrot.slane %v419_v17, %v1542_v44 }
 0x17d   : > { %v943_v54 = vcombine.low %v935_v30, %v942_v34  ;;  %v878_v55 = vcombine.low %v856_v36, %v863_v37  ;;  %v530_v56 = vrot.slane %v419_v17, %v1545_v45  ;;  %v534_v57 = vrot.slane %v419_v17, %v1548_v46 }
 0x17e   : > { %v879_v58 = vcombine.low %v870_v39, %v877_v50  ;;  %v538_v59 = vrot.slane %v419_v17, %v1551_v47  ;;  %v797_v60 = vcombine.low %v510_v32, %v514_v33  ;;  %v798_v61 = vcombine.low %v518_v51, %v522_v52 }
 0x17f   : > { %1104 = vperm.xlu1 %1409, %v943_v54   ;;  %v886_v62 = vrot.slane %v878_v55, %v1554_v49  ;;  %v799_v63 = vcombine.low %v526_v53, %v530_v56  ;;  %v638_v0 = vrot.slane %v431_v48, %v1530_v40  ;;  %v642_v1 = vrot.slane %v431_v48, %v1533_v41 }
 0x180   : > { %v893_v2 = vrot.slane %v879_v58, %v1554_v49  ;;  %v800_v3 = vcombine.low %v534_v57, %v538_v59  ;;  %v807_v4 = vrot.slane %v797_v60, %v1554_v49  ;;  %v814_v5 = vrot.slane %v798_v61, %v1554_v49  ;;  %v1218_v58 = vld [vmem:[#allocation2] sm:$0x1] }
 0x181   : > { %v821_v7 = vrot.slane %v799_v63, %v1554_v49  ;;  %v646_v8 = vrot.slane %v431_v48, %v1536_v42  ;;  %v650_v9 = vrot.slane %v431_v48, %v1539_v43  ;;  %v654_v10 = vrot.slane %v431_v48, %v1542_v44 }
 0x182   : > { %v894_v11 = vcombine.low %v886_v62, %v893_v2  ;;  %v828_v12 = vrot.slane %v800_v3, %v1554_v49  ;;  %v829_v13 = vcombine.low %v807_v4, %v814_v5  ;;  %v658_v14 = vrot.slane %v431_v48, %v1545_v45 }
 0x183   : > { %v662_v15 = vrot.slane %v431_v48, %v1548_v46  ;;  %v666_v16 = vrot.slane %v431_v48, %v1551_v47  ;;  %v993_v17 = vcombine.low %v638_v0, %v642_v1  ;;  %v994_v18 = vcombine.low %v646_v8, %v650_v9 }
 0x184   : > { %1101 = vperm.xlu1 %1409, %v894_v11   ;;  %v830_v19 = vcombine.low %v821_v7, %v828_v12  ;;  %v837_v20 = vrot.slane %v829_v13, %v1554_v49  ;;  %v995_v21 = vcombine.low %v654_v10, %v658_v14  ;;  %v670_v22 = vrot.slane %v434_v6, %v1530_v40 }
 0x185   : > { %v996_v23 = vcombine.low %v662_v15, %v666_v16  ;;  %v1003_v24 = vrot.slane %v993_v17, %v1554_v49  ;;  %v1010_v25 = vrot.slane %v994_v18, %v1554_v49  ;;  %v674_v26 = vrot.slane %v434_v6, %v1533_v41 }
 0x186   : > { %v844_v27 = vrot.slane %v830_v19, %v1554_v49  ;;  %v1017_v28 = vrot.slane %v995_v21, %v1554_v49  ;;  %v678_v29 = vrot.slane %v434_v6, %v1536_v42  ;;  %v682_v30 = vrot.slane %v434_v6, %v1539_v43 }
 0x187   : > { %v1024_v31 = vrot.slane %v996_v23, %v1554_v49  ;;  %v1025_v32 = vcombine.low %v1003_v24, %v1010_v25  ;;  %v686_v40 = vrot.slane %v434_v6, %v1542_v44  ;;  %v690_v33 = vrot.slane %v434_v6, %v1545_v45 }
 0x188   : > { %v845_v34 = vcombine.low %v837_v20, %v844_v27  ;;  %v694_v36 = vrot.slane %v434_v6, %v1548_v46  ;;  %v698_v41 = vrot.slane %v434_v6, %v1551_v47  ;;  %v1042_v37 = vcombine.low %v670_v22, %v674_v26 }
 0x189   : > { %v1026_v39 = vcombine.low %v1017_v28, %v1024_v31  ;;  %v1033_v48 = vrot.slane %v1025_v32, %v1554_v49  ;;  %v1043_v50 = vcombine.low %v678_v29, %v682_v30  ;;  %v1044_v42 = vcombine.low %v686_v40, %v690_v33 }
 0x18a   : > { %1098 = vperm.xlu1 %1409, %v845_v34   ;;  %v1045_v43 = vcombine.low %v694_v36, %v698_v41  ;;  %v1052_v51 = vrot.slane %v1042_v37, %v1554_v49  ;;  %v1219_v59 = vmax.f32 %v1218_v58, 0.0  ;;  %v1441_v60 = vmov 0.0  }
 0x18b   : > { %v1040_v52 = vrot.slane %v1026_v39, %v1554_v49  ;;  %v1059_v44 = vrot.slane %v1043_v50, %v1554_v49  ;;  %v1066_v45 = vrot.slane %v1044_v42, %v1554_v49  ;;  %193 = vst.msk [vmem:[#allocation5] sm:$0x1] %vm191_vm2, %v1441_v60  ;;  %v1116_v5 = vand.u32 127, %v443_v35  ;;  %v409_v42 = vld [vmem:[#allocation4] sm:$0x1] }
 0x18c   : > { %v1073_v46 = vrot.slane %v1045_v43, %v1554_v49  ;;  %1410 = vrsqrt.f32 %v1219_v59  ;;  %vm1222_vm3 = vcmp.eq.f32.partialorder %v1219_v59, inf  ;;  %v1225_v0 = vand.u32 2147483648, %v1219_v59 }
 0x18d   : > { %v1041_v53 = vcombine.low %v1033_v48, %v1040_v52  ;;  %v1074_v47 = vcombine.low %v1052_v51, %v1059_v44  ;;  %vm1224_vm4 = vcmp.eq.f32.partialorder %v1219_v59, 0.0  ;;  %v1121_v7 = vadd.s32 4294967288, %v1116_v5 }
 0x18e   : > { %v1075_v54 = vcombine.low %v1066_v45, %v1073_v46  ;;  %v1128_v8 = vadd.s32 4294967280, %v1116_v5  ;;  %v1119_v9 = vsub.s32 %v1116_v5, %v1527_v38  ;;  %v1135_v10 = vadd.s32 4294967272, %v1116_v5 }
 0x18f   : > { %1110 = vperm.xlu1 %1409, %v1041_v53   ;;  %v1082_v55 = vrot.slane %v1074_v47, %v1554_v49  ;;  %v1124_v13 = vsub.s32 %v1121_v7, %v1527_v38  ;;  %v1142_v14 = vadd.s32 4294967264, %v1116_v5  ;;  %v1149_v18 = vadd.s32 4294967256, %v1116_v5 }
 0x190   : > { %v1089_v56 = vrot.slane %v1075_v54, %v1554_v49  ;;  %v1131_v15 = vsub.s32 %v1128_v8, %v1527_v38  ;;  %v1138_v17 = vsub.s32 %v1135_v10, %v1527_v38  ;;  %v1156_v21 = vadd.s32 4294967248, %v1116_v5 }
 0x191   : > { %v1145_v35 = vsub.s32 %v1142_v14, %v1527_v38  ;;  %v1152_v25 = vsub.s32 %v1149_v18, %v1527_v38  ;;  %v1163_v27 = vadd.s32 4294967240, %v1116_v5 }
 0x192   : > { %v1090_v57 = vcombine.low %v1082_v55, %v1089_v56  ;;  %v1159_v30 = vsub.s32 %v1156_v21, %v1527_v38  ;;  %v1203_v46 = vld [vmem:[#allocation5] sm:$0x1] }
 0x193   : > { %v1166_v33 = vsub.s32 %v1163_v27, %v1527_v38 }
 0x194   : > { %1113 = vperm.xlu1 %1409, %v1090_v57  }
 0x199   : > { %v1411_v61 = vpop.eup %1410 }
 0x19a   : > { %v1221_v62 = vmul.f32 %v1411_v61, %v1219_v59 }
 0x19c   : > { %v1223_v63 = vsel %vm1222_vm3, %v1219_v59, %v1221_v62 }
 0x19d   : > { %v1226_v1 = vsel %vm1224_vm4, %v1225_v0, %v1223_v63 }
 0x19e   : > { %v1227_v2 = vsel %vm191_vm2, %v1226_v1, 0.0 }
 0x1b8   : > { %1228 = vadd.xlane.f32.xlu1 %v1227_v2 }
 0x1eb   : > { %v1096_v3 = vpop.permute.xlu1 %1095 }
 0x1ec   : > { %v1125_v19 = vrot.slane %v1096_v3, %v1124_v13 }
 0x1ef   : > { %v1093_v12 = vpop.permute.xlu0 %1092 }
 0x1f0   : > { %v1120_v16 = vrot.slane %v1093_v12, %v1119_v9 }
 0x1f2   : > { %v1127_v23 = vsel %vm1126_vm5, %v1125_v19, %v1120_v16 }
 0x1f5   : > { %v1108_v4 = vpop.permute.xlu1 %1107 }
 0x1f6   : > { %v1153_v40 = vrot.slane %v1108_v4, %v1152_v25 }
 0x1fa   : > { %v1105_v6 = vpop.permute.xlu1 %1104 }
 0x1fb   : > { %v1146_v28 = vrot.slane %v1105_v6, %v1145_v35 }
 0x1ff   : > { %v1102_v11 = vpop.permute.xlu1 %1101 }
 0x200   : > { %v1139_v24 = vrot.slane %v1102_v11, %v1138_v17 }
 0x205   : > { %v1099_v20 = vpop.permute.xlu1 %1098 }
 0x206   : > { %v1132_v22 = vrot.slane %v1099_v20, %v1131_v15 }
 0x208   : > { %v1134_v26 = vsel %vm1133_vm6, %v1132_v22, %v1127_v23 }
 0x209   : > { %v1141_v29 = vsel %vm1140_vm7, %v1139_v24, %v1134_v26 }
 0x20a   : > { %v1111_v31 = vpop.permute.xlu1 %1110  ;;  %v1148_v32 = vsel %vm1147_vm8, %v1146_v28, %v1141_v29 }
 0x20b   : > { %v1160_v34 = vrot.slane %v1111_v31, %v1159_v30  ;;  %v1155_v36 = vsel %vm1154_vm9, %v1153_v40, %v1148_v32 }
 0x20d   : > { %v1162_v39 = vsel %vm1161_vm10, %v1160_v34, %v1155_v36 }
 0x20f   : > { %v1114_v41 = vpop.permute.xlu1 %1113 }
 0x210   : > { %v1167_v37 = vrot.slane %v1114_v41, %v1166_v33 }
 0x212   : > { %v1169_v48 = vsel %vm1168_vm11, %v1167_v37, %v1162_v39 }
 0x213   : > { %v1176_v50 = vrot.slane %v1169_v48, %v1554_v49 }
 0x215   : > { %v1183_v43 = vrot.slane %v1176_v50, %v1554_v49 }
 0x217   : > { %v1185_v51 = vmin.f32 %v409_v42, %v1183_v43 }
 0x219   : > { %1186 = vst.msk [vmem:[#allocation4] sm:$0x1] %vm191_vm2, %v1185_v51 }
 0x220   : > { %v1204_v52 = vld [vmem:[#allocation4] sm:$0x1] }
 0x221   : > { %v1205_v44 = vmax.f32 %v1204_v52, 0.0 }
 0x223   : > { %1412 = vrsqrt.f32 %v1205_v44  ;;  %vm1208_vm12 = vcmp.eq.f32.partialorder %v1205_v44, inf  ;;  %v1211_v53 = vand.u32 2147483648, %v1205_v44  ;;  %vm1210_vm13 = vcmp.eq.f32.partialorder %v1205_v44, 0.0 }
 0x230   : > { %v1413_v38 = vpop.eup %1412 }
 0x231   : > { %v1207_v45 = vmul.f32 %v1413_v38, %v1205_v44 }
 0x233   : > { %v1209_v47 = vsel %vm1208_vm12, %v1205_v44, %v1207_v45 }
 0x234   : > { %v1212_v54 = vsel %vm1210_vm13, %v1211_v53, %v1209_v47 }
 0x235   : > { %v1213_v55 = vadd.f32 %v1212_v54, %v1203_v46 }
 0x237   : > { %1214 = vst.msk [vmem:[#allocation5] sm:$0x1] %vm191_vm2, %v1213_v55 }
 0x23e   : > { %v1237_v56 = vld [vmem:[#allocation5] sm:$0x1] }
 0x23f   : > { %v1238_v49 = vsel %vm191_vm2, %v1237_v56, 0.0 }
 0x240   : > { %1239 = vadd.xlane.f32.xlu0 %v1238_v49 }
 0x241   : > { %v1229_v57 = vpop.xlane.xlu1 %1228 }
 0x242   : > { %v1230_v58 = vrot.slane %v1229_v57, 4 }
 0x244   : > { %v1231_v59 = vadd.f32 %v1230_v58, %v1229_v57 }
 0x246   : > { %v1232_v60 = vrot.slane %v1231_v59, 2 }
 0x248   : > { %v1233_v61 = vadd.f32 %v1232_v60, %v1231_v59 }
 0x24a   : > { %v1234_v62 = vrot.slane %v1233_v61, 1 }
 0x24c   : > { %v1235_v63 = vadd.f32 %v1234_v62, %v1233_v61 }
 0x24e   : > { %1376 = vpush %v1235_v63 }
 0x27f   : > { %s1377_s21 = spop %1376 }
 0x2c9   : > { %v1240_v0 = vpop.xlane.xlu0 %1239 }
 0x2ca   : > { %v1241_v1 = vrot.slane %v1240_v0, 4 }
 0x2cc   : > { %v1242_v2 = vadd.f32 %v1241_v1, %v1240_v0 }
 0x2ce   : > { %v1243_v3 = vrot.slane %v1242_v2, 2 }
 0x2d0   : > { %v1244_v4 = vadd.f32 %v1243_v3, %v1242_v2 }
 0x2d2   : > { %v1245_v5 = vrot.slane %v1244_v4, 1 }
 0x2d4   : > { %v1246_v6 = vadd.f32 %v1245_v5, %v1244_v4 }
 0x2d6   : > { %1378 = vpush %v1246_v6 }
 0x307   : > { %s1379_s22 = spop %1378 }
 0x308   : > { %s1248_s26 = sadd.f32 %s1379_s22, %s1377_s21 }
 0x30a   : > { %v1249_v7 = vstv %s1248_s26 }
 0x30b   : > { %1250 = vst [vmem:[%s186_s25] sm:$0xff] %v1249_v7 }
 0x30c PF: > { %s12_s11 = sadd.s32 1, %s1436_s11   ;;  %s1701_s9 = smov %s1432_s10 }
 0x30d   : > { %p9_p5 = scmp.ge.s32.totalorder %s12_s11, 4   ;;  %s1702_s10 = smov %s1704_s12 }
 0x30f   :  { %11 = sbr.rel (!%p9_p5) target bundleno = 2 (0x2), region = 69 }

</bundles_post_ra>
